<compile_context>
chip_gen: v7x
topology: tpu7x:2x2x1
jax: 0.10.0
libtpu: 0.0.40
codegen_flags: <defaults>
</compile_context>

<pallas_src>
import math

import jax
import jax.numpy as jnp
from jax.experimental import pallas as pl
from jax.experimental.pallas import tpu as pltpu


def build_positional_encoding(d_model: int, max_len: int = 5000) -> jnp.ndarray:
    """Deterministic sinusoidal table, shape (max_len, 1, d_model)."""
    position = jnp.arange(0, max_len, dtype=jnp.float32)[:, None]            # (L, 1)
    div_term = jnp.exp(
        jnp.arange(0, d_model, 2, dtype=jnp.float32) * (-math.log(10000.0) / d_model)
    )                                                                         # (D/2,)
    pe = jnp.zeros((max_len, d_model), dtype=jnp.float32)
    pe = pe.at[:, 0::2].set(jnp.sin(position * div_term))
    pe = pe.at[:, 1::2].set(jnp.cos(position * div_term))
    # unsqueeze(0).transpose(0, 1) -> (max_len, 1, d_model)
    return pe[:, None, :]


def _round_up(n: int, m: int) -> int:
    return ((n + m - 1) // m) * m


def positional_encoding_forward(x: jnp.ndarray, pe: jnp.ndarray,
                                *, row_tile: int | None = None) -> jnp.ndarray:
    """x: (seq, batch, d_model); pe: (max_len, 1, d_model). Returns x + pe[:seq]."""
    S, B, D = x.shape
    max_len = pe.shape[0]

    # Match pe dtype to x (halves pe HBM bytes for bf16 inputs; the add then
    # happens natively in x.dtype — on v5e prefer f32 x if bf16 VPU matters).
    pe2 = pe.astype(x.dtype).reshape(max_len, D)      # (max_len, D), free reshape
    x2 = x.reshape(S, B * D)                          # lane-dense view, free reshape

    # Tile the sequence axis. Target ~2 MiB per x tile so the double-buffered
    # (x_in + out + pe) working set stays well under the default scoped-VMEM
    # limit on every generation (16 MiB v5e, 32 MiB v6e/v7x).
    if row_tile is None:
        bytes_per_row = B * D * jnp.dtype(x.dtype).itemsize
        target_rows = max(1, (2 * 1024 * 1024) // bytes_per_row)
        row_tile = max(8, min(_round_up(S, 8), _round_up(target_rows, 8)))
    else:
        row_tile = max(8, min(_round_up(S, 8), _round_up(row_tile, 8)))

    grid = (pl.cdiv(S, row_tile),)

    def _add_pe_kernel(x_ref, pe_ref, o_ref):
        # x_ref: (row_tile, B*D), pe_ref: (row_tile, D)
        pe_tile = pe_ref[...]
        if B > 1:
            # Replicate pe across the batch lanes: [pe | pe | ... | pe].
            # (jnp.tile is the supported in-kernel replacement for pltpu.repeat.)
            pe_tile = jnp.tile(pe_tile, (1, B))       # (row_tile, B*D)
        o_ref[...] = x_ref[...] + pe_tile

    out2 = pl.pallas_call(
        _add_pe_kernel,
        out_shape=jax.ShapeDtypeStruct((S, B * D), x.dtype),
        grid=grid,
        in_specs=[
            pl.BlockSpec((row_tile, B * D), lambda i: (i, 0)),
            # pe comes straight from the full (max_len, D) table; index_map
            # selects the seq tile — no separate slice copy in HBM.
            pl.BlockSpec((row_tile, D), lambda i: (i, 0)),
        ],
        out_specs=pl.BlockSpec((row_tile, B * D), lambda i: (i, 0)),
        compiler_params=pltpu.CompilerParams(
            # Seq tiles are independent -> shard across both TCs on v7x;
            # harmless no-op on single-TC v5e/v6e.
            dimension_semantics=("parallel",),
        ),
    )(x2, pe2)

    return out2.reshape(S, B, D)


if __name__ == "__main__":
    d_model = 32
    max_len = 512
    seq_len = 128
    batch = 2

    key = jax.random.PRNGKey(0)
    x = jax.random.normal(key, (seq_len, batch, d_model), dtype=jnp.float32)

    pe = build_positional_encoding(d_model, max_len)

    # Small row_tile so the demo exercises a multi-step, pipelined grid (4 steps).
    out = positional_encoding_forward(x, pe, row_tile=32)
    out = jax.block_until_ready(out)

    # correctness check against pure-JAX reference
    ref = x + pe[:seq_len]
    assert out.shape == (seq_len, batch, d_model)
    assert jnp.allclose(out, ref, atol=1e-6), "mismatch vs reference"

    print("KERNEL_OK")
</pallas_src>

<mosaic_0001>
module attributes {stable_mosaic.version = 11 : i64} {
  func.func @_add_pe_kernel(%arg0: i32, %arg1: memref<32x64xf32, #tpu.memory_space<vmem>>, %arg2: memref<32x32xf32, #tpu.memory_space<vmem>>, %arg3: memref<32x64xf32, #tpu.memory_space<vmem>>) attributes {dimension_semantics = [#tpu.dimension_semantics<parallel>], iteration_bounds = array<i64: 4>, scalar_prefetch = 0 : i64, scratch_operands = 0 : i64, tpu.core_type = #tpu.core_type<tc>, window_params = [{transform_indices = @transform_0, window_bounds = array<i64: 32, 64>}, {transform_indices = @transform_1, window_bounds = array<i64: 32, 32>}, {transform_indices = @transform_2, window_bounds = array<i64: 32, 64>}]} {
    %c0 = arith.constant 0 : index
    %c0_0 = arith.constant 0 : index
    %0 = vector.load %arg2[%c0, %c0_0] : memref<32x32xf32, #tpu.memory_space<vmem>>, vector<32x32xf32>
    %1 = tpu.concatenate %0, %0 in 1 : vector<32x32xf32>, vector<32x32xf32> -> vector<32x64xf32>
    %c0_1 = arith.constant 0 : index
    %c0_2 = arith.constant 0 : index
    %2 = vector.load %arg1[%c0_1, %c0_2] : memref<32x64xf32, #tpu.memory_space<vmem>>, vector<32x64xf32>
    %3 = arith.addf %2, %1 : vector<32x64xf32>
    %c0_3 = arith.constant 0 : index
    %c0_4 = arith.constant 0 : index
    %4 = vector.load %arg3[%c0_3, %c0_4] : memref<32x64xf32, #tpu.memory_space<vmem>>, vector<32x64xf32>
    tpu.vector_store %arg3[%c0_3, %c0_4], %3 {strides = array<i32>} : memref<32x64xf32, #tpu.memory_space<vmem>>, vector<32x64xf32>,
    return
  }
  func.func @transform_0(%arg0: i32) -> (i32, i32) {
    %c0_i32 = arith.constant 0 : i32
    %c0_i32_0 = arith.constant 0 : i32
    return %arg0, %c0_i32 : i32, i32
  }
  func.func @transform_1(%arg0: i32) -> (i32, i32) {
    %c0_i32 = arith.constant 0 : i32
    %c0_i32_0 = arith.constant 0 : i32
    return %arg0, %c0_i32 : i32, i32
  }
  func.func @transform_2(%arg0: i32) -> (i32, i32) {
    %c0_i32 = arith.constant 0 : i32
    %c0_i32_0 = arith.constant 0 : i32
    return %arg0, %c0_i32 : i32, i32
  }
}

</mosaic_0001>

<bundles_post_ra>
// kernel: tpu_custom_call.1
= control target key start
LH: loop header
LB: loop body
LE: loop exit
PB: predicated region body
PF: predicated region fallthrough
CT: control target
= control target key end

     0   :  { %s321_s9 = smov 0   ;;  %s349_s0 = inlined_call_operand.vmem [shape: f32[128,64], index: 0, kind: input, shape index: {}]   ;;  %s350_s1 = inlined_call_operand.vmem [shape: f32[512,32], index: 1, kind: input, shape index: {}]   ;;  %s351_s2 = inlined_call_operand.vmem [shape: f32[128,64], index: 2, kind: output, shape index: {}]  }
   0x1 LB: > { %s275_s10 = sadd.s32 4294967295, %s303_s9   ;;  %p279_p0 = scmp.ge.s32.totalorder %s303_s9, 1  ;;  %s303_s9 = sphi %s321_s9, %s12_s9  }
   0x2   : > { %p124_p1 = scmp.lt.s32.totalorder %s303_s9, 5 }
   0x4   : > { %p125_p2 = pnand %p279_p0, %p124_p1 }
   0x5   : > { %s280_s11 = sshll.u32 (!%p125_p2), %s275_s10, 2  ;;  %s305_s17 = smov (!%p125_p2), 32   ;;  %vm189_vm0 = vcmask (!%p125_p2), 261120   ;;  %vm202_vm1 = vcmask (!%p125_p2), 523264  }
   0x6   : > { %128 = sbr.rel (%p125_p2) target bundleno = 141 (0x8d), region = 28  ;;  %p158_p3 = scmp.lt.s32.totalorder (!%p125_p2), %s280_s11, 63 }
   0x7   : > { %p152_p4 = scmp.lt.s32.totalorder (!%p125_p2), %s280_s11, 15 }
   0xd   : > { %s159_s12 = scalar_select %p158_p3, %s280_s11, 63 }
   0xe   : > { %s353_s11 = smov (!%p152_p4, %s280_s11), 15 }
   0xf   : > { %s283_s13 = sshll.u32 %s159_s12, 3  ;;  %s281_s18 = sshll.u32 %s353_s11, 3 }
  0x10   : > { %s161_s16 = scalar_lea.vmem %s350_s1, %s283_s13  ;;  %s155_s21 = scalar_lea.vmem %s349_s0, %s281_s18 }
  0x11   : > { %v171_v0 = vld [vmem:[%s161_s16 + $0x10] sm:$0xff]  ;;  %v169_v1 = vld [vmem:[%s161_s16] sm:$0xff]  ;;  %v172_v2 = vld [vmem:[%s161_s16 + $0x18] sm:$0xff]  ;;  %s167_s24 = scalar_lea.vmem %s351_s2, %s281_s18 }
  0x12   : > { %181 = vrot.lane.b32.xlu1 %v171_v0, %s305_s17  ;;  %177 = vrot.lane.b32.xlu0 %v169_v1, %s305_s17  ;;  %v170_v3 = vld [vmem:[%s161_s16 + $0x8] sm:$0xff]  ;;  %v196_v4 = vld [vmem:[%s155_s21 + $0x10] sm:$0xff] }
  0x13   : > { %v194_v5 = vld [vmem:[%s155_s21] sm:$0xff]  ;;  %v197_v12 = vld [vmem:[%s155_s21 + $0x18] sm:$0xff]  ;;  %v195_v13 = vld [vmem:[%s155_s21 + $0x8] sm:$0xff] }
  0x16   : > { %183 = vrot.lane.b32.xlu1 %v172_v2, %s305_s17  ;;  %179 = vrot.lane.b32.xlu0 %v170_v3, %s305_s17 }
  0x84   : > { %v182_v6 = vpop.permute.xlu1 %181  ;;  %v178_v7 = vpop.permute.xlu0 %177 }
  0x85   : > { %v192_v8 = vsel %vm189_vm0, %v171_v0, %v182_v6  ;;  %v190_v9 = vsel %vm189_vm0, %v169_v1, %v178_v7 }
  0x86   : > { %v200_v10 = vadd.f32 %v196_v4, %v192_v8  ;;  %v198_v11 = vadd.f32 %v194_v5, %v190_v9 }
  0x88   : > { %205 = vst.msk [vmem:[%s167_s24 + $0x10] sm:$0xff] %vm202_vm1, %v200_v10  ;;  %203 = vst.msk [vmem:[%s167_s24] sm:$0xff] %vm202_vm1, %v198_v11  ;;  %v184_v14 = vpop.permute.xlu1 %183  ;;  %v180_v15 = vpop.permute.xlu0 %179 }
  0x89   : > { %v193_v16 = vsel %vm189_vm0, %v172_v2, %v184_v14  ;;  %v191_v17 = vsel %vm189_vm0, %v170_v3, %v180_v15 }
  0x8a   : > { %v201_v18 = vadd.f32 %v197_v12, %v193_v16  ;;  %v199_v19 = vadd.f32 %v195_v13, %v191_v17 }
  0x8c   : > { %206 = vst.msk [vmem:[%s167_s24 + $0x18] sm:$0xff] %vm202_vm1, %v201_v18  ;;  %204 = vst.msk [vmem:[%s167_s24 + $0x8] sm:$0xff] %vm202_vm1, %v199_v19 }
  0x8d PF: > { %s12_s9 = sadd.s32 1, %s303_s9  }
  0x8e   : > { %p9_p5 = scmp.ge.s32.totalorder %s12_s9, 6  }
  0x90   :  { %11 = sbr.rel (!%p9_p5) target bundleno = 1 (0x1), region = 61 }

</bundles_post_ra>
